<compile_context>
chip_gen: v7x
topology: tpu7x:2x2x1
jax: 0.10.0
libtpu: 0.0.40
codegen_flags: <defaults>
</compile_context>

<pallas_src>
import functools

import jax
import jax.numpy as jnp
import numpy as np
from jax.experimental import pallas as pl
from jax.experimental.pallas import tpu as pltpu


# ----------------------------------------------------------------------------
# Fused kernel: conv-as-matmul (transposed) + bias + relu + L2 normalize
# ----------------------------------------------------------------------------
def _pddm_fused_kernel(pt_ref, w_ref, b_ref, o_ref):
    # pt_ref: (Kp, HW)  transposed im2col patches for one batch element
    # w_ref:  (OC, Kp)  flattened conv weight (zero-padded along K)
    # b_ref:  (OC, 1)   conv bias (broadcast along lanes)
    # o_ref:  (OC, HW)  normalized features, already in NCHW flatten order
    acc = jnp.dot(w_ref[...], pt_ref[...], preferred_element_type=jnp.float32)
    y = jnp.maximum(acc + b_ref[...], 0.0)
    # F.normalize(p=2, dim=1, eps=1e-12): y / max(||y||, eps)
    #   == y * rsqrt(max(sum(y^2), eps^2)).
    # The L2 norm is permutation-invariant, so reducing over the (OC, HW)
    # block equals reducing over PyTorch's flattened (OC*HW,) row.
    ssq = jnp.sum(y * y)                       # XLU cross-lane reduce
    inv = jax.lax.rsqrt(jnp.maximum(ssq, 1e-24))   # EUP rsqrt, no divide
    o_ref[...] = y * inv


def pddm_fused(patches_t, w_flat, bias):
    """patches_t: (B, Kp, HW) f32; w_flat: (OC, Kp) f32; bias: (OC, 1) f32."""
    B, Kp, HW = patches_t.shape
    OC = w_flat.shape[0]
    return pl.pallas_call(
        _pddm_fused_kernel,
        out_shape=jax.ShapeDtypeStruct((B, OC, HW), jnp.float32),
        grid=(B,),
        in_specs=[
            pl.BlockSpec((None, Kp, HW), lambda b: (b, 0, 0)),
            pl.BlockSpec((OC, Kp), lambda b: (0, 0)),   # grid-invariant
            pl.BlockSpec((OC, 1), lambda b: (0, 0)),    # grid-invariant
        ],
        out_specs=pl.BlockSpec((None, OC, HW), lambda b: (b, 0, 0)),
        compiler_params=pltpu.CompilerParams(
            dimension_semantics=("parallel",)),
    )(patches_t, w_flat, bias)


# ----------------------------------------------------------------------------
# Glue: transposed im2col extraction + K padding (pure layout work)
# ----------------------------------------------------------------------------
@functools.partial(jax.jit, static_argnames=())
def pddm_forward(x, conv_w, conv_b):
    """x: (B, C, H, W) f32; conv_w: (OC, C, 3, 3); conv_b: (OC,)."""
    B, C, H, W = x.shape
    OC, _, KH, KW = conv_w.shape
    K = C * KH * KW
    Kp = -(-K // 8) * 8                 # pad contraction dim to sublane multiple

    # SAME padding for the stride-1 conv.
    ph, pw = KH // 2, KW // 2
    xp = jnp.pad(x.astype(jnp.float32),
                 ((0, 0), (0, 0), (ph, ph), (pw, pw)))

    # TODO(synk): for large H,W move this 9x im2col expansion into the kernel
    # (per-offset slices / accumulating dots) to avoid the 9x HBM blowup; at
    # these shapes it is ~300 KiB total and irrelevant.
    shifts = [xp[:, :, kh:kh + H, kw:kw + W]        # (B, C, H, W) each
              for kh in range(KH) for kw in range(KW)]
    # (B, C, KH*KW, H, W) -> (B, K, H*W): K index = c*(KH*KW)+(kh*KW+kw)
    # matches torch's OIHW weight flattening; HW index = h*W+w matches NCHW.
    pat_t = jnp.stack(shifts, axis=2).reshape(B, K, H * W)
    pat_t = jnp.pad(pat_t, ((0, 0), (0, Kp - K), (0, 0)))

    w_flat = jnp.pad(conv_w.reshape(OC, K).astype(jnp.float32),
                     ((0, 0), (0, Kp - K)))
    bias = conv_b.reshape(OC, 1).astype(jnp.float32)

    # --- single fused Pallas kernel: conv matmul + bias + relu + normalize ---
    out = pddm_fused(pat_t, w_flat, bias)           # (B, OC, H*W), NCHW order
    return out.reshape(B, OC * H * W)


# ----------------------------------------------------------------------------
# Pure-JAX reference for sanity checking
# ----------------------------------------------------------------------------
def pddm_forward_ref(x, conv_w, conv_b):
    conv = jax.lax.conv_general_dilated(
        x, conv_w, window_strides=(1, 1), padding="SAME",
        dimension_numbers=("NCHW", "OIHW", "NCHW"))
    conv = conv + conv_b[None, :, None, None]
    feat = conv.reshape(x.shape[0], -1)
    y = jnp.maximum(feat, 0.0)
    n = jnp.sqrt(jnp.sum(y * y, axis=1, keepdims=True))
    return y / jnp.maximum(n, 1e-12)


if __name__ == "__main__":
    key = jax.random.PRNGKey(0)
    kx, kw, kb = jax.random.split(key, 3)

    B, C, H, W, OC = 2, 4, 16, 16, 8
    x = jax.random.normal(kx, (B, C, H, W), dtype=jnp.float32)
    conv_w = 0.1 * jax.random.normal(kw, (OC, C, 3, 3), dtype=jnp.float32)
    conv_b = 0.1 * jax.random.normal(kb, (OC,), dtype=jnp.float32)

    # TODO(synk): Pddm.criterion (pdist, wu/wv/wc/ws pair scoring, hardest-pair
    # argmin/argmax selection) is a training-time loss with data-dependent
    # host-side indexing; it is not part of forward and is not implemented.

    out = pddm_forward(x, conv_w, conv_b)
    out = jax.block_until_ready(out)

    ref = pddm_forward_ref(x, conv_w, conv_b)
    np.testing.assert_allclose(np.asarray(out), np.asarray(ref),
                               rtol=1e-4, atol=1e-5)
    assert out.shape == (B, OC * H * W)

    print("KERNEL_OK")
</pallas_src>

<mosaic_0001>
module attributes {stable_mosaic.version = 11 : i64} {
  func.func @_pddm_fused_kernel(%arg0: i32, %arg1: memref<1x40x256xf32, #tpu.memory_space<vmem>>, %arg2: memref<8x40xf32, #tpu.memory_space<vmem>>, %arg3: memref<8x1xf32, #tpu.memory_space<vmem>>, %arg4: memref<1x8x256xf32, #tpu.memory_space<vmem>>) attributes {dimension_semantics = [#tpu.dimension_semantics<parallel>], iteration_bounds = array<i64: 2>, scalar_prefetch = 0 : i64, scratch_operands = 0 : i64, tpu.core_type = #tpu.core_type<tc>, window_params = [{transform_indices = @transform_0, window_bounds = array<i64: 1, 40, 256>}, {pipeline_mode = #tpu.pipeline_mode<synchronous>, transform_indices = @transform_1, window_bounds = array<i64: 8, 40>}, {pipeline_mode = #tpu.pipeline_mode<synchronous>, transform_indices = @transform_2, window_bounds = array<i64: 8, 1>}, {transform_indices = @transform_3, window_bounds = array<i64: 1, 8, 256>}]} {
    %c0 = arith.constant 0 : index
    %c0_0 = arith.constant 0 : index
    %0 = vector.load %arg2[%c0, %c0_0] : memref<8x40xf32, #tpu.memory_space<vmem>>, vector<8x40xf32>
    %c0_1 = arith.constant 0 : index
    %c0_2 = arith.constant 0 : index
    %c0_3 = arith.constant 0 : index
    %1 = vector.load %arg1[%c0_1, %c0_2, %c0_3] : memref<1x40x256xf32, #tpu.memory_space<vmem>>, vector<1x40x256xf32>
    %2 = vector.shape_cast %1 : vector<1x40x256xf32> to vector<40x256xf32>
    %cst = arith.constant dense<0.000000e+00> : vector<8x256xf32>
    %3 = tpu.matmul %0, %2, %cst {dimension_numbers = #tpu.dot_dimension_numbers<[1], [0], [0], [1], [0, 0, 1, 1], [], []>} : vector<8x40xf32>, vector<40x256xf32>, vector<8x256xf32> -> vector<8x256xf32>
    %c0_4 = arith.constant 0 : index
    %c0_5 = arith.constant 0 : index
    %4 = vector.load %arg3[%c0_4, %c0_5] : memref<8x1xf32, #tpu.memory_space<vmem>>, vector<8x1xf32>
    %5 = vector.broadcast %4 : vector<8x1xf32> to vector<8x256xf32>
    %6 = arith.addf %3, %5 : vector<8x256xf32>
    %cst_6 = arith.constant 0.000000e+00 : f32
    %7 = vector.broadcast %cst_6 : f32 to vector<8x256xf32>
    %8 = arith.maximumf %6, %7 : vector<8x256xf32>
    %9 = arith.mulf %8, %8 : vector<8x256xf32>
    %10 = vector.shape_cast %9 : vector<8x256xf32> to vector<1x8x256xf32>
    %cst_7 = arith.constant dense<0.000000e+00> : vector<1xf32>
    %11 = vector.multi_reduction <add>, %10, %cst_7 [1, 2] : vector<1x8x256xf32> to vector<1xf32>
    %12 = vector.shape_cast %11 : vector<1xf32> to vector<1x1x1xf32>
    %13 = vector.extract %12[0, 0, 0] : f32 from vector<1x1x1xf32>
    %cst_8 = arith.constant 1.000000e-24 : f32
    %14 = arith.maximumf %13, %cst_8 : f32
    %15 = math.rsqrt %14 : f32
    %16 = vector.broadcast %15 : f32 to vector<8x256xf32>
    %17 = arith.mulf %8, %16 : vector<8x256xf32>
    %c0_9 = arith.constant 0 : index
    %c0_10 = arith.constant 0 : index
    %c0_11 = arith.constant 0 : index
    %18 = vector.load %arg4[%c0_9, %c0_10, %c0_11] : memref<1x8x256xf32, #tpu.memory_space<vmem>>, vector<1x8x256xf32>
    %19 = vector.shape_cast %18 : vector<1x8x256xf32> to vector<8x256xf32>
    %20 = vector.shape_cast %17 : vector<8x256xf32> to vector<1x8x256xf32>
    tpu.vector_store %arg4[%c0_9, %c0_10, %c0_11], %20 {strides = array<i32>} : memref<1x8x256xf32, #tpu.memory_space<vmem>>, vector<1x8x256xf32>,
    return
  }
  func.func @transform_0(%arg0: i32) -> (i32, i32, i32) {
    %c0_i32 = arith.constant 0 : i32
    %c0_i32_0 = arith.constant 0 : i32
    %c0_i32_1 = arith.constant 0 : i32
    return %arg0, %c0_i32, %c0_i32_0 : i32, i32, i32
  }
  func.func @transform_1(%arg0: i32) -> (i32, i32) {
    %c0_i32 = arith.constant 0 : i32
    %c0_i32_0 = arith.constant 0 : i32
    %c0_i32_1 = arith.constant 0 : i32
    return %c0_i32, %c0_i32_0 : i32, i32
  }
  func.func @transform_2(%arg0: i32) -> (i32, i32) {
    %c0_i32 = arith.constant 0 : i32
    %c0_i32_0 = arith.constant 0 : i32
    %c0_i32_1 = arith.constant 0 : i32
    return %c0_i32, %c0_i32_0 : i32, i32
  }
  func.func @transform_3(%arg0: i32) -> (i32, i32, i32) {
    %c0_i32 = arith.constant 0 : i32
    %c0_i32_0 = arith.constant 0 : i32
    %c0_i32_1 = arith.constant 0 : i32
    return %arg0, %c0_i32, %c0_i32_0 : i32, i32, i32
  }
}

</mosaic_0001>

<bundles_post_ra>
// kernel: pddm_forward.1
= control target key start
LH: loop header
LB: loop body
LE: loop exit
PB: predicated region body
PF: predicated region fallthrough
CT: control target
= control target key end

     0   :  { %s411_s12 = smov 0   ;;  %s438_s0 = inlined_call_operand.vmem [shape: f32[2,40,256], index: 0, kind: input, shape index: {}]   ;;  %s439_s1 = inlined_call_operand.vmem [shape: f32[8,40], index: 1, kind: input, shape index: {}]   ;;  %s440_s2 = inlined_call_operand.vmem [shape: f32[8,1], index: 2, kind: input, shape index: {}]   ;;  %s441_s3 = inlined_call_operand.vmem [shape: f32[2,8,256], index: 3, kind: output, shape index: {}]  }
   0x1 LB: > { %s341_s13 = sadd.s32 4294967295, %s386_s12   ;;  %p345_p0 = scmp.ge.s32.totalorder %s386_s12, 1  ;;  %s386_s12 = sphi %s411_s12, %s13_s12  }
   0x2   : > { %p137_p1 = scmp.lt.s32.totalorder %s386_s12, 3 }
   0x4   : > { %p138_p2 = pnand %p345_p0, %p137_p1 }
   0x5   : > { %p161_p3 = scmp.lt.s32.totalorder (!%p138_p2), %s341_s13, 1  ;;  %v182_v0 = vld [vmem:[%s440_s2] sm:$0xff] (!%p138_p2)  ;;  %v388_v1 = vmov (!%p138_p2), 0.0   ;;  %v389_v2 = vmov (!%p138_p2), 0   ;;  %vm188_vm0 = vcmask (!%p138_p2), 326656  }
   0x6   : > { %141 = sbr.rel (%p138_p2) target bundleno = 522 (0x20a), region = 32  ;;  %256 = vmatprep.mubr.f32.mxu0 (!%p138_p2), %v388_v1  ;;  %377 = vset.pattern.permute.xlu0 (!%p138_p2), %v389_v2  ;;  %v171_v17 = vld [vmem:[%s439_s1] sm:$0xff] (!%p138_p2)  ;;  %s390_s23 = smov (!%p138_p2), 1e-24  }
   0x7   : > { %185 = vperm.xlu0 (!%p138_p2), %377, %v182_v0  }
   0xd   : > { %s443_s13 = smov (!%p161_p3, %s341_s13), 1 }
   0xe   : > { %s361_s16 = smul.u32 80, %s443_s13  ;;  %s352_s25 = sshll.u32 %s443_s13, 4 }
   0xf   : > { %s170_s29 = scalar_lea.vmem %s441_s3, %s352_s25 }
  0x10   : > { %s165_s19 = scalar_lea.vmem %s438_s0, %s361_s16 }
  0x11   : > { %v173_v3 = vld [vmem:[%s165_s19 + $0x8] sm:$0xff]  ;;  %v175_v4 = vld [vmem:[%s165_s19 + $0x18] sm:$0xff]  ;;  %v172_v5 = vld [vmem:[%s165_s19] sm:$0xff] }
  0x12   : > { %v353_v6 = vpack.c.bf16 %v175_v4, %v173_v3  ;;  %v174_v7 = vld [vmem:[%s165_s19 + $0x10] sm:$0xff]  ;;  %v177_v8 = vld [vmem:[%s165_s19 + $0x28] sm:$0xff]  ;;  %v179_v9 = vld [vmem:[%s165_s19 + $0x38] sm:$0xff] }
  0x13   : > { %v355_v10 = vpack.c.bf16 %v174_v7, %v172_v5  ;;  %v357_v11 = vpack.c.bf16 %v179_v9, %v177_v8  ;;  %v176_v12 = vld [vmem:[%s165_s19 + $0x20] sm:$0xff]  ;;  %v178_v13 = vld [vmem:[%s165_s19 + $0x30] sm:$0xff]  ;;  %v181_v15 = vld [vmem:[%s165_s19 + $0x48] sm:$0xff] }
  0x14   : > { %354 = vmatprep.subr.bf16.mxu0 %v353_v6  ;;  %v359_v14 = vpack.c.bf16 %v178_v13, %v176_v12  ;;  %v180_v16 = vld [vmem:[%s165_s19 + $0x40] sm:$0xff] }
  0x15   : > { %356 = vmatpush1.bf16.msra.mxu0 %v355_v10 }
  0x16   : > { %358 = vmatprep.subr.bf16.mxu0 %v357_v11 }
  0x19   : > { %360 = vmatpush1.bf16.msra.mxu0 %v359_v14 }
  0x1a   : > { %200 = vmatprep.subr.mxu0 %v181_v15 }
  0x1d   : > { %201 = vmatpush1.msra.mxu0 %v180_v16 }
  0x1e   : > { %349 = vmatmul.mubr.msk.f32.vlgmr.msra.gmra.mrb[0].mxu0 %vm188_vm0, %v171_v17 }
  0x86   : > { %v186_v18 = vpop.permute.xlu0 %185 }
  0xf1   : > { %v258_v19 = vpop.f32.mrb[0].mxu0 }
  0xf2   : > { %v259_v20 = vadd.f32 %v258_v19, %v186_v18  ;;  %v260_v21 = vpop.f32.mrb[1].mxu0 }
  0xf3   : > { %v261_v22 = vadd.f32 %v260_v21, %v186_v18 }
  0xf4   : > { %v263_v23 = vmax.f32 %v259_v20, 0.0 }
  0xf5   : > { %v264_v24 = vmax.f32 %v261_v22, 0.0 }
  0xf6   : > { %v265_v25 = vmul.f32 %v263_v23, %v263_v23 }
  0xf7   : > { %v266_v26 = vmul.f32 %v264_v24, %v264_v24 }
  0xf9   : > { %v267_v27 = vadd.f32 %v266_v26, %v265_v25 }
  0xfb   : > { %268 = vadd.xlane.f32.xlu0 %v267_v27 }
 0x188   : > { %v269_v28 = vpop.xlane.xlu0 %268 }
 0x189   : > { %v270_v29 = vrot.slane %v269_v28, 4 }
 0x18b   : > { %v271_v30 = vadd.f32 %v270_v29, %v269_v28 }
 0x18d   : > { %v272_v31 = vrot.slane %v271_v30, 2 }
 0x18f   : > { %v273_v32 = vadd.f32 %v272_v31, %v271_v30 }
 0x191   : > { %v274_v33 = vrot.slane %v273_v32, 1 }
 0x193   : > { %v275_v34 = vadd.f32 %v274_v33, %v273_v32 }
 0x195   : > { %362 = vpush %v275_v34 }
 0x1c6   : > { %s363_s22 = spop %362 }
 0x1c7   : > { %s277_s24 = smax.f32 %s390_s23, %s363_s22 }
 0x1c8   : > { %v278_v35 = vstv %s277_s24 }
 0x1c9   : > { %378 = vrsqrt.f32 %v278_v35 }
 0x1d3   : > { %v379_v36 = vpop.eup %378 }
 0x1d4   : > { %364 = vpush %v379_v36 }
 0x205   : > { %s365_s26 = spop %364 }
 0x206   : > { %v281_v37 = vstv %s365_s26 }
 0x207   : > { %v282_v38 = vmul.f32 %v281_v37, %v263_v23  ;;  %v283_v39 = vmul.f32 %v281_v37, %v264_v24 }
 0x209   : > { %284 = vst [vmem:[%s170_s29] sm:$0xff] %v282_v38  ;;  %285 = vst [vmem:[%s170_s29 + $0x8] sm:$0xff] %v283_v39 }
 0x20a PF: > { %s13_s12 = sadd.s32 1, %s386_s12  }
 0x20b   : > { %p10_p4 = scmp.ge.s32.totalorder %s13_s12, 4  }
 0x20d   :  { %12 = sbr.rel (!%p10_p4) target bundleno = 1 (0x1), region = 62 }

</bundles_post_ra>
